<compile_context>
chip_gen: v7x
topology: tpu7x:2x2x1
jax: 0.10.0
libtpu: 0.0.40
codegen_flags: <defaults>
</compile_context>

<pallas_src>
import functools

import jax
import jax.numpy as jnp
from jax import lax
from jax.experimental import pallas as pl
from jax.experimental.pallas import tpu as pltpu

NUM_CLASSES = 29
_LANES = 128


def _vmem_capacity_bytes():
    try:
        cap = int(pltpu.get_tpu_info().vmem_capacity_bytes)
        if cap > 0:
            return cap
    except Exception:
        pass
    return 64 * 1024 * 1024  # conservative (v7x per-TC physical)


# --------------------------------------------------------------------------
# Kernel 1: stream the (T, B, D) activation, emit ies + per-chunk partials.
# --------------------------------------------------------------------------
def _stream_kernel(x_ref, wc_ref, bc_ref,
                   ies_ref, xmax_ref, smax_ref, smin_ref,
                   *, seq_len, t_tile, nt_per_chunk):
    p = pl.program_id(0)
    t = pl.program_id(1)

    # Init the per-chunk running reductions at the first tile of this chunk.
    @pl.when(t == 0)
    def _init():
        xmax_ref[...] = jnp.full_like(xmax_ref, -jnp.inf)
        smax_ref[...] = jnp.full_like(smax_ref, -jnp.inf)
        smin_ref[...] = jnp.full_like(smin_ref, jnp.inf)

    x = x_ref[...].astype(jnp.float32)                 # (t_tile, B, D)
    wc_vec = wc_ref[...][None].astype(jnp.float32)     # (1, 1, D) lane-dense row

    # is_event_scores = Linear(D -> 1): VPU mul + lane (XLU) reduce.
    ies = jnp.sum(x * wc_vec, axis=-1) + bc_ref[0]     # (t_tile, B)
    ies_ref[...] = ies

    def _fold(x_m, ies_hi, ies_lo):
        xmax_ref[...] = jnp.maximum(xmax_ref[...],
                                    jnp.max(x_m, axis=0, keepdims=True))
        smax_ref[...] = jnp.maximum(
            smax_ref[...], jnp.max(ies_hi, axis=0, keepdims=True)[None])
        smin_ref[...] = jnp.minimum(
            smin_ref[...], jnp.min(ies_lo, axis=0, keepdims=True)[None])

    rem = seq_len % t_tile
    if rem == 0:
        # Exact tiling: no masking ever traced.
        _fold(x, ies, ies)
    else:
        # Only the globally-last tile is partial; full tiles take the
        # unmasked fast path at runtime.
        is_partial = jnp.logical_and(p == pl.num_programs(0) - 1,
                                     t == nt_per_chunk - 1)

        @pl.when(jnp.logical_not(is_partial))
        def _full():
            _fold(x, ies, ies)

        @pl.when(is_partial)
        def _partial():
            row = lax.broadcasted_iota(jnp.int32, ies.shape, 0)
            valid = row < rem
            _fold(jnp.where(valid[:, :, None], x, -jnp.inf),
                  jnp.where(valid, ies, -jnp.inf),
                  jnp.where(valid, ies, jnp.inf))
    # Note: garbage ies rows of a partial tile are dropped by the partial
    # output-block writeback.


# --------------------------------------------------------------------------
# Kernel 2: combine per-chunk partials, event classifier, masked softmax.
# --------------------------------------------------------------------------
def _finalize_kernel(xmax_p_ref, we_ref, be_ref, shi_ref, slo_ref,
                     raw_ref, es_ref, *, num_classes):
    xmax = jnp.max(xmax_p_ref[...], axis=0)            # (B, D)
    raw = jnp.dot(xmax, we_ref[...],
                  preferred_element_type=jnp.float32) + be_ref[...]   # (B, Cpad)
    raw_ref[...] = raw

    sig_hi = jax.nn.sigmoid(shi_ref[...])              # (B, 1) columns
    sig_lo = jax.nn.sigmoid(slo_ref[...])
    # max_t sigmoid(ies) * raw without materializing (B, T, C).
    logits = jnp.where(raw >= 0.0, raw * sig_hi, raw * sig_lo)

    # Softmax over the real classes only (class axis is lane-padded to 128).
    col = lax.broadcasted_iota(jnp.int32, logits.shape, 1)
    logits = jnp.where(col < num_classes, logits, -jnp.inf)
    m = jnp.max(logits, axis=-1, keepdims=True)
    e = jnp.exp(logits - m)
    es_ref[...] = e * pl.reciprocal(jnp.sum(e, axis=-1, keepdims=True))


# --------------------------------------------------------------------------
# Wrapper
# --------------------------------------------------------------------------
def weakly_localization_forward(fused_content, wc, bc, we, be, *, t_tile=None):
    """fused_content: (T, B, D) f32 or bf16. Returns ((B,T), (B,C), (B,C))."""
    T, B, D = fused_content.shape
    C = we.shape[1]
    c_pad = max(_LANES, pl.cdiv(C, _LANES) * _LANES)
    itemsize = fused_content.dtype.itemsize

    # Lane-dense parameter layouts (tiny, one-time glue).
    wc_row = jnp.reshape(wc, (1, D)).astype(jnp.float32)       # (1, D)
    bc_s = jnp.reshape(bc, (1,)).astype(jnp.float32)
    we_p = jnp.pad(we.astype(jnp.float32), ((0, 0), (0, c_pad - C)))
    be_p = jnp.pad(jnp.reshape(be, (1, C)).astype(jnp.float32),
                   ((0, 0), (0, c_pad - C)))

    # ---- time tiling / chunking from a generation-aware VMEM budget -------
    cap = _vmem_capacity_bytes()
    vmem_limit = min(64 * 1024 * 1024, cap // 2)   # 32 MiB on v7x, 64 MiB v5e/v6e
    row_in = B * D * itemsize                      # one time row of x
    row_out = B * 4                                # one time row of ies (f32)
    reserve = 2 * B * D * 4 + (1 << 20)            # xmax accumulator bufs + slack

    auto = t_tile is None
    if auto:
        per_buf = min(16 * 1024 * 1024,
                      max(64 * 1024, (vmem_limit * 3 // 4 - reserve) // 2))
        fit = max(8, (per_buf // (row_in + row_out)) // 8 * 8)
        t_tile = T if fit >= T else fit
    t_tile = min(int(t_tile), T)
    if t_tile != T:
        t_tile = max(8, (t_tile // 8) * 8)

    nt = pl.cdiv(T, t_tile)
    if auto:
        # Prefer >= 2 tiles so v7x can shard the time axis across its 2 TCs.
        if nt == 1 and T >= 16:
            t_tile = ((pl.cdiv(T, 2) + 7) // 8) * 8
            nt = pl.cdiv(T, t_tile)
        while nt % 2 == 1 and nt > 1 and t_tile > 8:
            t_tile -= 8
            nt = pl.cdiv(T, t_tile)
    num_chunks = 2 if (nt >= 2 and nt % 2 == 0) else 1
    nt_per_chunk = nt // num_chunks

    est = 2 * t_tile * (row_in + row_out) + reserve + (2 << 20)
    vmem_limit = int(min(cap * 3 // 4, max(vmem_limit, est)))

    kernel = functools.partial(_stream_kernel, seq_len=T, t_tile=t_tile,
                               nt_per_chunk=nt_per_chunk)

    out_shapes = (
        jax.ShapeDtypeStruct((T, B), jnp.float32),                  # ies (T,B)
        jax.ShapeDtypeStruct((num_chunks, B, D), jnp.float32),      # max_t x
        jax.ShapeDtypeStruct((num_chunks, 1, B), jnp.float32),      # max_t ies
        jax.ShapeDtypeStruct((num_chunks, 1, B), jnp.float32),      # min_t ies
    )

    grid_spec = pltpu.PrefetchScalarGridSpec(
        num_scalar_prefetch=0,
        grid=(num_chunks, nt_per_chunk),
        in_specs=[
            pl.BlockSpec((t_tile, B, D),
                         lambda p, t: (p * nt_per_chunk + t, 0, 0)),   # x
            pl.BlockSpec((1, D), lambda p, t: (0, 0)),                 # wc row
            pl.BlockSpec(memory_space=pltpu.MemorySpace.SMEM),         # bc
        ],
        out_specs=[
            pl.BlockSpec((t_tile, B), lambda p, t: (p * nt_per_chunk + t, 0)),
            pl.BlockSpec((1, B, D), lambda p, t: (p, 0, 0)),
            pl.BlockSpec((1, 1, B), lambda p, t: (p, 0, 0)),
            pl.BlockSpec((1, 1, B), lambda p, t: (p, 0, 0)),
        ],
    )

    cost = pl.CostEstimate(
        flops=int(3 * T * B * D + 4 * T * B),
        transcendentals=0,
        bytes_accessed=int(itemsize * T * B * D
                           + 4 * (T * B + D + num_chunks * (B * D + 2 * B))),
    )

    ies_tb, xmax_p, smax_p, smin_p = pl.pallas_call(
        kernel,
        out_shape=out_shapes,
        grid_spec=grid_spec,
        compiler_params=pltpu.CompilerParams(
            dimension_semantics=("parallel", "arbitrary"),
            vmem_limit_bytes=vmem_limit,
        ),
        cost_estimate=cost,
    )(fused_content, wc_row, bc_s)

    # Tiny cross-chunk combine of the score stats, reshaped to (B, 1) columns
    # so the finalize kernel never needs a row->column relayout.
    smax_col = jnp.max(smax_p[:, 0, :], axis=0)[:, None]    # (B, 1)
    smin_col = jnp.min(smin_p[:, 0, :], axis=0)[:, None]    # (B, 1)

    raw_p, es_p = pl.pallas_call(
        functools.partial(_finalize_kernel, num_classes=C),
        out_shape=(jax.ShapeDtypeStruct((B, c_pad), jnp.float32),
                   jax.ShapeDtypeStruct((B, c_pad), jnp.float32)),
    )(xmax_p, we_p, be_p, smax_col, smin_col)

    # Glue: (T, B) -> (B, T) and strip the class padding.
    return ies_tb.T, raw_p[:, :C], es_p[:, :C]


# --------------------------------------------------------------------------
# Pure-JAX reference (mirrors the torch module) and self-test.
# --------------------------------------------------------------------------
def _reference(fused_content, wc, bc, we, be):
    x = jnp.transpose(fused_content, (1, 0, 2)).astype(jnp.float32)   # (B,T,D)
    ies = jnp.einsum("btd,dk->btk", x, wc) + jnp.reshape(bc, (1, 1, 1))
    max_x = jnp.max(x, axis=1)                                        # (B, D)
    raw = max_x @ we + jnp.reshape(be, (1, -1))                       # (B, C)
    fused = jax.nn.sigmoid(ies) * raw[:, None, :]                     # (B, T, C)
    logits = jnp.max(fused, axis=1)
    es = jax.nn.softmax(logits, axis=-1)
    return jnp.squeeze(ies, -1), raw, es


if __name__ == "__main__":
    def run_case(T, B, D, t_tile=None, dtype=jnp.float32, atol=1e-5, rtol=1e-5):
        key = jax.random.PRNGKey(0)
        k1, k2, k3, k4, k5 = jax.random.split(key, 5)
        fused_content = jax.random.normal(k1, (T, B, D), jnp.float32).astype(dtype)
        wc = 0.1 * jax.random.normal(k2, (D, 1), jnp.float32)
        bc = 0.1 * jax.random.normal(k3, (1, 1), jnp.float32)
        we = 0.1 * jax.random.normal(k4, (D, NUM_CLASSES), jnp.float32)
        be = 0.1 * jax.random.normal(k5, (1, NUM_CLASSES), jnp.float32)

        ies, raw, es = weakly_localization_forward(
            fused_content, wc, bc, we, be, t_tile=t_tile)
        jax.block_until_ready((ies, raw, es))

        r_ies, r_raw, r_es = _reference(
            fused_content.astype(jnp.float32), wc, bc, we, be)
        assert bool(jnp.allclose(ies, r_ies, atol=atol, rtol=rtol)), (T, B, D)
        assert bool(jnp.allclose(raw, r_raw, atol=atol, rtol=rtol)), (T, B, D)
        assert bool(jnp.allclose(es, r_es, atol=atol, rtol=rtol)), (T, B, D)

    # single tile, single chunk
    run_case(T=8, B=2, D=32)
    # multi-tile, single chunk, partial last tile (odd tile count)
    run_case(T=20, B=2, D=32, t_tile=8)
    # two parallel time chunks, exact tiling
    run_case(T=32, B=4, D=64, t_tile=8)
    # two parallel time chunks with a partial globally-last tile
    run_case(T=28, B=2, D=32, t_tile=8)
    # auto-tiling path with a forced two-chunk split
    run_case(T=40, B=2, D=32)
    # bf16 input stream (compute stays f32)
    run_case(T=32, B=4, D=64, t_tile=8, dtype=jnp.bfloat16, atol=1e-4, rtol=1e-4)

    print("KERNEL_OK")
</pallas_src>

<mosaic_0001>
module attributes {stable_mosaic.version = 11 : i64} {
  func.func @_stream_kernel(%arg0: i32, %arg1: i32, %arg2: memref<8x2x32xf32, #tpu.memory_space<vmem>>, %arg3: memref<1x32xf32, #tpu.memory_space<vmem>>, %arg4: memref<1xf32, #tpu.memory_space<smem>>, %arg5: memref<8x2xf32, #tpu.memory_space<vmem>>, %arg6: memref<1x2x32xf32, #tpu.memory_space<vmem>>, %arg7: memref<1x1x2xf32, #tpu.memory_space<vmem>>, %arg8: memref<1x1x2xf32, #tpu.memory_space<vmem>>) attributes {dimension_semantics = [#tpu.dimension_semantics<parallel>, #tpu.dimension_semantics<arbitrary>], iteration_bounds = array<i64: 1, 1>, scalar_prefetch = 0 : i64, scratch_operands = 0 : i64, tpu.core_type = #tpu.core_type<tc>, window_params = [{transform_indices = @transform_0, window_bounds = array<i64: 8, 2, 32>}, {pipeline_mode = #tpu.pipeline_mode<synchronous>, transform_indices = @transform_1, window_bounds = array<i64: 1, 32>}, {transform_indices = @transform_2, window_bounds = array<i64: 1>}, {transform_indices = @transform_3, window_bounds = array<i64: 8, 2>}, {transform_indices = @transform_4, window_bounds = array<i64: 1, 2, 32>}, {transform_indices = @transform_5, window_bounds = array<i64: 1, 1, 2>}, {transform_indices = @transform_6, window_bounds = array<i64: 1, 1, 2>}]} {
    %c0_i32 = arith.constant 0 : i32
    %0 = arith.cmpi eq, %arg1, %c0_i32 : i32
    %1 = arith.extui %0 : i1 to i32
    %c0_i32_0 = arith.constant 0 : i32
    %2 = arith.cmpi ne, %1, %c0_i32_0 : i32
    scf.if %2 {
      %cst_29 = arith.constant 0xFF800000 : f32
      %30 = vector.broadcast %cst_29 : f32 to vector<1x2x32xf32>
      %c0_30 = arith.constant 0 : index
      %c0_31 = arith.constant 0 : index
      %c0_32 = arith.constant 0 : index
      %31 = vector.load %arg6[%c0_30, %c0_31, %c0_32] : memref<1x2x32xf32, #tpu.memory_space<vmem>>, vector<1x2x32xf32>
      tpu.vector_store %arg6[%c0_30, %c0_31, %c0_32], %30 {strides = array<i32>} : memref<1x2x32xf32, #tpu.memory_space<vmem>>, vector<1x2x32xf32>,
      %cst_33 = arith.constant 0xFF800000 : f32
      %32 = vector.broadcast %cst_33 : f32 to vector<1x1x2xf32>
      %c0_34 = arith.constant 0 : index
      %c0_35 = arith.constant 0 : index
      %c0_36 = arith.constant 0 : index
      %33 = vector.load %arg7[%c0_34, %c0_35, %c0_36] : memref<1x1x2xf32, #tpu.memory_space<vmem>>, vector<1x1x2xf32>
      tpu.vector_store %arg7[%c0_34, %c0_35, %c0_36], %32 {strides = array<i32>} : memref<1x1x2xf32, #tpu.memory_space<vmem>>, vector<1x1x2xf32>,
      %cst_37 = arith.constant 0x7F800000 : f32
      %34 = vector.broadcast %cst_37 : f32 to vector<1x1x2xf32>
      %c0_38 = arith.constant 0 : index
      %c0_39 = arith.constant 0 : index
      %c0_40 = arith.constant 0 : index
      %35 = vector.load %arg8[%c0_38, %c0_39, %c0_40] : memref<1x1x2xf32, #tpu.memory_space<vmem>>, vector<1x1x2xf32>
      tpu.vector_store %arg8[%c0_38, %c0_39, %c0_40], %34 {strides = array<i32>} : memref<1x1x2xf32, #tpu.memory_space<vmem>>, vector<1x1x2xf32>,
    } else {
    }
    %c0 = arith.constant 0 : index
    %c0_1 = arith.constant 0 : index
    %c0_2 = arith.constant 0 : index
    %3 = vector.load %arg2[%c0, %c0_1, %c0_2] : memref<8x2x32xf32, #tpu.memory_space<vmem>>, vector<8x2x32xf32>
    %c0_3 = arith.constant 0 : index
    %c0_4 = arith.constant 0 : index
    %4 = vector.load %arg3[%c0_3, %c0_4] : memref<1x32xf32, #tpu.memory_space<vmem>>, vector<1x32xf32>
    %5 = vector.shape_cast %4 : vector<1x32xf32> to vector<1x1x32xf32>
    %6 = vector.broadcast %5 : vector<1x1x32xf32> to vector<8x2x32xf32>
    %7 = arith.mulf %3, %6 : vector<8x2x32xf32>
    %cst = arith.constant dense<0.000000e+00> : vector<8x2xf32>
    %8 = vector.multi_reduction <add>, %7, %cst [2] : vector<8x2x32xf32> to vector<8x2xf32>
    %c0_5 = arith.constant 0 : index
    %9 = memref.load %arg4[%c0_5] : memref<1xf32, #tpu.memory_space<smem>>
    %10 = vector.broadcast %9 : f32 to vector<8x2xf32>
    %11 = arith.addf %8, %10 : vector<8x2xf32>
    %c0_6 = arith.constant 0 : index
    %c0_7 = arith.constant 0 : index
    %12 = vector.load %arg5[%c0_6, %c0_7] : memref<8x2xf32, #tpu.memory_space<vmem>>, vector<8x2xf32>
    tpu.vector_store %arg5[%c0_6, %c0_7], %11 {strides = array<i32>} : memref<8x2xf32, #tpu.memory_space<vmem>>, vector<8x2xf32>,
    %c0_8 = arith.constant 0 : index
    %c0_9 = arith.constant 0 : index
    %c0_10 = arith.constant 0 : index
    %13 = vector.load %arg6[%c0_8, %c0_9, %c0_10] : memref<1x2x32xf32, #tpu.memory_space<vmem>>, vector<1x2x32xf32>
    %cst_11 = arith.constant dense<0xFF800000> : vector<2x32xf32>
    %14 = vector.multi_reduction <maximumf>, %3, %cst_11 [0] : vector<8x2x32xf32> to vector<2x32xf32>
    %15 = vector.shape_cast %14 : vector<2x32xf32> to vector<1x2x32xf32>
    %16 = arith.maximumf %13, %15 : vector<1x2x32xf32>
    %c0_12 = arith.constant 0 : index
    %c0_13 = arith.constant 0 : index
    %c0_14 = arith.constant 0 : index
    %17 = vector.load %arg6[%c0_12, %c0_13, %c0_14] : memref<1x2x32xf32, #tpu.memory_space<vmem>>, vector<1x2x32xf32>
    tpu.vector_store %arg6[%c0_12, %c0_13, %c0_14], %16 {strides = array<i32>} : memref<1x2x32xf32, #tpu.memory_space<vmem>>, vector<1x2x32xf32>,
    %c0_15 = arith.constant 0 : index
    %c0_16 = arith.constant 0 : index
    %c0_17 = arith.constant 0 : index
    %18 = vector.load %arg7[%c0_15, %c0_16, %c0_17] : memref<1x1x2xf32, #tpu.memory_space<vmem>>, vector<1x1x2xf32>
    %cst_18 = arith.constant dense<0xFF800000> : vector<2xf32>
    %19 = vector.multi_reduction <maximumf>, %11, %cst_18 [0] : vector<8x2xf32> to vector<2xf32>
    %20 = vector.shape_cast %19 : vector<2xf32> to vector<1x2xf32>
    %21 = vector.shape_cast %20 : vector<1x2xf32> to vector<1x1x2xf32>
    %22 = arith.maximumf %18, %21 : vector<1x1x2xf32>
    %c0_19 = arith.constant 0 : index
    %c0_20 = arith.constant 0 : index
    %c0_21 = arith.constant 0 : index
    %23 = vector.load %arg7[%c0_19, %c0_20, %c0_21] : memref<1x1x2xf32, #tpu.memory_space<vmem>>, vector<1x1x2xf32>
    tpu.vector_store %arg7[%c0_19, %c0_20, %c0_21], %22 {strides = array<i32>} : memref<1x1x2xf32, #tpu.memory_space<vmem>>, vector<1x1x2xf32>,
    %c0_22 = arith.constant 0 : index
    %c0_23 = arith.constant 0 : index
    %c0_24 = arith.constant 0 : index
    %24 = vector.load %arg8[%c0_22, %c0_23, %c0_24] : memref<1x1x2xf32, #tpu.memory_space<vmem>>, vector<1x1x2xf32>
    %cst_25 = arith.constant dense<0x7F800000> : vector<2xf32>
    %25 = vector.multi_reduction <minimumf>, %11, %cst_25 [0] : vector<8x2xf32> to vector<2xf32>
    %26 = vector.shape_cast %25 : vector<2xf32> to vector<1x2xf32>
    %27 = vector.shape_cast %26 : vector<1x2xf32> to vector<1x1x2xf32>
    %28 = arith.minimumf %24, %27 : vector<1x1x2xf32>
    %c0_26 = arith.constant 0 : index
    %c0_27 = arith.constant 0 : index
    %c0_28 = arith.constant 0 : index
    %29 = vector.load %arg8[%c0_26, %c0_27, %c0_28] : memref<1x1x2xf32, #tpu.memory_space<vmem>>, vector<1x1x2xf32>
    tpu.vector_store %arg8[%c0_26, %c0_27, %c0_28], %28 {strides = array<i32>} : memref<1x1x2xf32, #tpu.memory_space<vmem>>, vector<1x1x2xf32>,
    return
  }
  func.func @transform_0(%arg0: i32, %arg1: i32) -> (i32, i32, i32) {
    %c1_i32 = arith.constant 1 : i32
    %0 = arith.muli %arg0, %c1_i32 : i32
    %1 = arith.addi %0, %arg1 : i32
    %c0_i32 = arith.constant 0 : i32
    %c0_i32_0 = arith.constant 0 : i32
    %c0_i32_1 = arith.constant 0 : i32
    return %1, %c0_i32, %c0_i32_0 : i32, i32, i32
  }
  func.func @transform_1(%arg0: i32, %arg1: i32) -> (i32, i32) {
    %c0_i32 = arith.constant 0 : i32
    %c0_i32_0 = arith.constant 0 : i32
    %c0_i32_1 = arith.constant 0 : i32
    return %c0_i32, %c0_i32_0 : i32, i32
  }
  func.func @transform_2(%arg0: i32, %arg1: i32) -> i32 {
    %c0_i32 = arith.constant 0 : i32
    %c0_i32_0 = arith.constant 0 : i32
    return %c0_i32 : i32
  }
  func.func @transform_3(%arg0: i32, %arg1: i32) -> (i32, i32) {
    %c1_i32 = arith.constant 1 : i32
    %0 = arith.muli %arg0, %c1_i32 : i32
    %1 = arith.addi %0, %arg1 : i32
    %c0_i32 = arith.constant 0 : i32
    %c0_i32_0 = arith.constant 0 : i32
    return %1, %c0_i32 : i32, i32
  }
  func.func @transform_4(%arg0: i32, %arg1: i32) -> (i32, i32, i32) {
    %c0_i32 = arith.constant 0 : i32
    %c0_i32_0 = arith.constant 0 : i32
    %c0_i32_1 = arith.constant 0 : i32
    return %arg0, %c0_i32, %c0_i32_0 : i32, i32, i32
  }
  func.func @transform_5(%arg0: i32, %arg1: i32) -> (i32, i32, i32) {
    %c0_i32 = arith.constant 0 : i32
    %c0_i32_0 = arith.constant 0 : i32
    %c0_i32_1 = arith.constant 0 : i32
    return %arg0, %c0_i32, %c0_i32_0 : i32, i32, i32
  }
  func.func @transform_6(%arg0: i32, %arg1: i32) -> (i32, i32, i32) {
    %c0_i32 = arith.constant 0 : i32
    %c0_i32_0 = arith.constant 0 : i32
    %c0_i32_1 = arith.constant 0 : i32
    return %arg0, %c0_i32, %c0_i32_0 : i32, i32, i32
  }
}

</mosaic_0001>

<bundles_post_ra>
// kernel: tpu_custom_call.1
= control target key start
LH: loop header
LB: loop body
LE: loop exit
PB: predicated region body
PF: predicated region fallthrough
CT: control target
= control target key end

     0   :  { %13 = vsyncpa [#allocation4], 0  ;;  %s680_s0 = inlined_call_operand.hbm [shape: f32[8,2,32], index: 0, kind: input, shape index: {}]   ;;  %s681_s1 = inlined_call_operand.vmem [shape: f32[1,32], index: 1, kind: input, shape index: {}]   ;;  %s682_s2 = inlined_call_operand.<no memory space> [shape: f32[1], index: 2, kind: input, shape index: {}]   ;;  %s683_s3 = inlined_call_operand.vmem [shape: f32[8,2], index: 3, kind: output, shape index: {0}]   ;;  %s684_s4 = inlined_call_operand.hbm [shape: f32[1,2,32], index: 4, kind: output, shape index: {1}]   ;;  %s685_s5 = inlined_call_operand.hbm [shape: f32[1,1,2], index: 5, kind: output, shape index: {2}]   ;;  %s686_s6 = inlined_call_operand.hbm [shape: f32[1,1,2], index: 6, kind: output, shape index: {3}]  }
   0x1   :  { %14 = vsyncpa [#allocation5], 0 }
   0x2   :  { %15 = vsyncpa [#allocation8], 0  ;;  %s498_s21 = smov [#allocation3]   ;;  %s404_s25 = scalar_lea.hbm %s680_s0, 256 }
   0x3   :  { %s25_s22 = sshll.u32 %s498_s21, 4  ;;  %p405_p0 = scmp.ne.s32.totalorder %s680_s0, %s404_s25  ;;  %s26_s22 = int_to_ptr.vmem [resolvable:$true] %s25_s22 }
   0x4   :  { %p408_p1 = scmp.lt.u32.totalorder %s404_s25, %s680_s0 }
   0x6   :  { %p410_p2 = pnand %p408_p1, %p405_p0 }
   0x8   :  { %413 = shalt.err (!%p410_p2)
}
   0x9   :  { %s414_s30 = scalar_lea.vmem %s26_s22, 256  ;;  %p419_p4 = scmp.lt.s32.totalorder %s26_s22, %s26_s22 }
   0xa   :  { %p415_p3 = scmp.ne.s32.totalorder %s26_s22, %s414_s30  ;;  %p420_p5 = scmp.lt.s32.totalorder %s414_s30, %s414_s30 }
   0xc   :  { %p421_p6 = por %p420_p5, %p419_p4 }
   0xe   :  { %p422_p7 = pnand %p421_p6, %p415_p3 }
  0x10   :  { %425 = shalt.err (!%p422_p7)
}
  0x11   :  { %s499_s7 = smov 32   ;;  %s500_s8 = smov 2  }
  0x12   :  { %31 = dma.hbm_to_vmem [thread:$0]  %s680_s0, 256, %s26_s22, [#allocation4], %s499_s7, %s499_s7, %s500_s8  }
  0x13   :  { %492 = dma.done.wait [#allocation4], 256  }
  0x14   :  { %493 = vsyncadd [#allocation4], 4294967040  ;;  %vm56_vm0 = vcmask 254976   ;;  %v63_v0 = vld [vmem:[#allocation3 + $0x4] sm:$0x3]  ;;  %v501_v40 = vmov 0   ;;  %v127_v42 = vlaneseq  ;;  %v110_v45 = vstv %s682_s2 }
  0x15   :  { %v391_v1 = vld [vmem:[%s681_s1] ss:$0 sm:$0xff]  ;;  %v64_v5 = vld [vmem:[#allocation3 + $0x6] sm:$0x3]  ;;  %v62_v6 = vld [vmem:[#allocation3 + $0x2] sm:$0x3]  ;;  %403 = vset.pattern.permute.xlu1 %v501_v40  ;;  %402 = vset.pattern.permute.xlu0 %v501_v40 }
  0x16   :  { %v61_v2 = vld [vmem:[#allocation3] sm:$0x3]  ;;  %v78_v3 = vmul.f32 %v391_v1, %v63_v0  ;;  %v79_v8 = vmul.f32 %v391_v1, %v64_v5  ;;  %v77_v9 = vmul.f32 %v391_v1, %v62_v6  ;;  %v180_v10 = vsel %vm56_vm0, %v62_v6, -inf  ;;  %v66_v11 = vld [vmem:[#allocation3 + $0xa] sm:$0x3] }
  0x17   :  { %v76_v4 = vmul.f32 %v391_v1, %v61_v2  ;;  %v179_v7 = vsel %vm56_vm0, %v61_v2, -inf  ;;  %v65_v12 = vld [vmem:[#allocation3 + $0x8] sm:$0x3]  ;;  %v182_v15 = vsel %vm56_vm0, %v64_v5, -inf  ;;  %v185_v16 = vsel %vm56_vm0, %v66_v11, -inf }
  0x18   :  { %v91_v13 = vsel %vm56_vm0, %v78_v3, 0.0  ;;  %v181_v17 = vsel %vm56_vm0, %v63_v0, -inf  ;;  %v94_v18 = vsel %vm56_vm0, %v79_v8, 0.0  ;;  %v81_v19 = vmul.f32 %v391_v1, %v66_v11  ;;  %v68_v21 = vld [vmem:[#allocation3 + $0xe] sm:$0x3] }
  0x19   :  { %v85_v14 = vsel %vm56_vm0, %v76_v4, 0.0  ;;  %92 = vadd.xlane.f32.xlu1 %v91_v13  ;;  %v186_v20 = vmax.f32 %v180_v10, %v185_v16  ;;  %v88_v22 = vsel %vm56_vm0, %v77_v9, 0.0  ;;  %v80_v23 = vmul.f32 %v391_v1, %v65_v12  ;;  %v67_v28 = vld [vmem:[#allocation3 + $0xc] sm:$0x3] }
  0x1a   :  { %86 = vadd.xlane.f32.xlu0 %v85_v14  ;;  %v183_v24 = vsel %vm56_vm0, %v65_v12, -inf  ;;  %v189_v25 = vsel %vm56_vm0, %v68_v21, -inf  ;;  %v187_v29 = vsel %vm56_vm0, %v67_v28, -inf  ;;  %v100_v32 = vsel %vm56_vm0, %v81_v19, 0.0 }
  0x1b   :  { %v184_v26 = vmax.f32 %v179_v7, %v183_v24  ;;  %v190_v27 = vmax.f32 %v182_v15, %v189_v25  ;;  %v188_v31 = vmax.f32 %v181_v17, %v187_v29  ;;  %v97_v33 = vsel %vm56_vm0, %v80_v23, 0.0 }
  0x1c   :  { %v83_v34 = vmul.f32 %v391_v1, %v68_v21  ;;  %v82_v35 = vmul.f32 %v391_v1, %v67_v28  ;;  %vm58_vm1 = vcmask 8192   ;;  %v502_v41 = vmov inf  }
  0x1d   :  { %95 = vadd.xlane.f32.xlu1 %v94_v18  ;;  %v570_v30 = vmax.f32 %v184_v26, %v186_v20  ;;  %v574_v36 = vmax.f32 %v188_v31, %v190_v27  ;;  %60 = vst.msk [vmem:[#allocation9] sm:$0x1] %vm58_vm1, %v502_v41  ;;  %v128_v43 = vand.u32 127, %v127_v42  ;;  %v581_v44 = vshrl.u32 %v127_v42, 7 }
  0x1e   :  { %89 = vadd.xlane.f32.xlu0 %v88_v22  ;;  %v106_v38 = vsel %vm56_vm0, %v83_v34, 0.0  ;;  %v103_v39 = vsel %vm56_vm0, %v82_v35, 0.0  ;;  %vm197_vm2 = vcmask 1041408   ;;  %vm161_vm3 = vcmask 1041409  }
  0x1f   :  { %v193_v37 = vmax.f32 %v570_v30, %v574_v36  ;;  %v587_v48 = vsub.s32 %v128_v43, %v581_v44  ;;  %vm163_vm4 = vcmask 1042434   ;;  %vm165_vm5 = vcmask 1043459  }
  0x20   :  { %vm167_vm6 = vcmask 1044484   ;;  %vm169_vm7 = vcmask 1045509   ;;  %vm171_vm8 = vcmask 1046534   ;;  %vm173_vm9 = vcmask 1047559  }
  0x21   :  { %101 = vadd.xlane.f32.xlu1 %v100_v32  ;;  %v503_v63 = vmov 1966171168   ;;  %vm176_vm10 = vcmask 15360   ;;  %v216_v41 = vsub.s32 0, %v581_v44 }
  0x22   :  { %98 = vadd.xlane.f32.xlu0 %v97_v33  ;;  %v224_v0 = vunpack.c.l.s4 %v503_v63 }
  0x25   :  { %107 = vadd.xlane.f32.xlu1 %v106_v38 }
  0x26   :  { %104 = vadd.xlane.f32.xlu0 %v103_v39 }
  0xa6   :  { %v93_v46 = vpop.xlane.xlu1 %92 }
  0xa7   :  { %v87_v47 = vpop.xlane.xlu0 %86  ;;  %v113_v50 = vadd.f32 %v110_v45, %v93_v46  ;;  %v225_v46 = vunpack.c.0.s8 %v224_v0 }
  0xa8   :  { %v111_v49 = vadd.f32 %v110_v45, %v87_v47 }
  0xa9   :  { %v140_v57 = vrot.slane %v113_v50, %v587_v48  ;;  %v200_v1 = vsel %vm197_vm2, %v113_v50, -inf  ;;  %v265_v32 = vsel %vm197_vm2, %v113_v50, inf }
  0xaa   :  { %v96_v51 = vpop.xlane.xlu1 %95  ;;  %v132_v55 = vrot.slane %v111_v49, %v587_v48  ;;  %v198_v2 = vsel %vm197_vm2, %v111_v49, -inf  ;;  %v263_v5 = vsel %vm197_vm2, %v111_v49, inf }
  0xab   :  { %v90_v52 = vpop.xlane.xlu0 %89  ;;  %v114_v54 = vadd.f32 %v110_v45, %v96_v51 }
  0xac   :  { %v112_v53 = vadd.f32 %v110_v45, %v90_v52 }
  0xad   :  { %v144_v3 = vrot.slane %v114_v54, %v587_v48  ;;  %v201_v6 = vsel %vm197_vm2, %v114_v54, -inf  ;;  %v266_v19 = vsel %vm197_vm2, %v114_v54, inf  ;;  %v228_v54 = vsub.s32 %v225_v46, %v581_v44 }
  0xae   :  { %v136_v56 = vrot.slane %v112_v53, %v587_v48  ;;  %v102_v58 = vpop.xlane.xlu1 %101  ;;  %v199_v9 = vsel %vm197_vm2, %v112_v53, -inf  ;;  %v264_v15 = vsel %vm197_vm2, %v112_v53, inf }
  0xaf   :  { %v99_v59 = vpop.xlane.xlu0 %98  ;;  %v116_v61 = vadd.f32 %v110_v45, %v102_v58 }
  0xb0   :  { %v162_v60 = vsel %vm161_vm3, %v136_v56, %v132_v55  ;;  %v115_v62 = vadd.f32 %v110_v45, %v99_v59 }
  0xb1   :  { %v164_v4 = vsel %vm163_vm4, %v140_v57, %v162_v60  ;;  %v204_v7 = vsel %vm197_vm2, %v116_v61, -inf  ;;  %v269_v8 = vsel %vm197_vm2, %v116_v61, inf  ;;  %v152_v20 = vrot.slane %v116_v61, %v587_v48 }
  0xb2   :  { %v166_v10 = vsel %vm165_vm5, %v144_v3, %v164_v4  ;;  %v148_v11 = vrot.slane %v115_v62, %v587_v48  ;;  %v202_v12 = vsel %vm197_vm2, %v115_v62, -inf  ;;  %v108_v13 = vpop.xlane.xlu1 %107  ;;  %v267_v16 = vsel %vm197_vm2, %v115_v62, inf }
  0xb3   :  { %v105_v14 = vpop.xlane.xlu0 %104  ;;  %v118_v17 = vadd.f32 %v110_v45, %v108_v13  ;;  %v205_v21 = vmax.f32 %v199_v9, %v204_v7  ;;  %v270_v22 = vmin.f32 %v264_v15, %v269_v8  ;;  %v203_v24 = vmax.f32 %v198_v2, %v202_v12 }
  0xb4   :  { %v117_v18 = vadd.f32 %v110_v45, %v105_v14  ;;  %v168_v23 = vsel %vm167_vm6, %v148_v11, %v166_v10  ;;  %v268_v27 = vmin.f32 %v263_v5, %v267_v16  ;;  %v220_v45 = vsub.s32 1, %v581_v44 }
  0xb5   :  { %v208_v25 = vsel %vm197_vm2, %v118_v17, -inf  ;;  %v273_v26 = vsel %vm197_vm2, %v118_v17, inf  ;;  %v160_v28 = vrot.slane %v118_v17, %v587_v48  ;;  %v170_v38 = vsel %vm169_vm7, %v152_v20, %v168_v23 }
  0xb6   :  { %v209_v29 = vmax.f32 %v201_v6, %v208_v25  ;;  %v274_v31 = vmin.f32 %v266_v19, %v273_v26  ;;  %v156_v33 = vrot.slane %v117_v18, %v587_v48  ;;  %v206_v34 = vsel %vm197_vm2, %v117_v18, -inf }
  0xb7   :  { %v271_v35 = vsel %vm197_vm2, %v117_v18, inf  ;;  %v207_v39 = vmax.f32 %v200_v1, %v206_v34  ;;  %v210_v42 = vmax.f32 %v203_v24, %v205_v21  ;;  %v275_v47 = vmin.f32 %v268_v27, %v270_v22 }
  0xb8   :  { %v272_v40 = vmin.f32 %v265_v32, %v271_v35  ;;  %v172_v43 = vsel %vm171_vm8, %v156_v33, %v170_v38  ;;  %v504_v1 = vmov -inf  }
  0xb9   :  { %v174_v49 = vsel %vm173_vm9, %v160_v28, %v172_v43  ;;  %v211_v50 = vmax.f32 %v207_v39, %v209_v29  ;;  %59 = vst.msk [vmem:[#allocation7] sm:$0x1] %vm58_vm1, %v504_v1 }
  0xba   :  { %v276_v51 = vmin.f32 %v272_v40, %v274_v31  ;;  %177 = vst.msk [vmem:[%s683_s3] sm:$0xff] %vm176_vm10, %v174_v49  ;;  %s505_s3 = smov [#allocation6]  }
  0xbb   :  { %v212_v52 = vmax.f32 %v210_v42, %v211_v50  ;;  %57 = vst.msk [vmem:[#allocation6] sm:$0x3] %vm56_vm0, %v504_v1  ;;  %s340_s14 = sshll.u32 %s505_s3, 4  ;;  %s341_s14 = int_to_ptr.vmem [resolvable:$true] %s340_s14 }
  0xbc   :  { %v277_v53 = vmin.f32 %v275_v47, %v276_v51  ;;  %s426_s15 = scalar_lea.vmem %s341_s14, 32  ;;  %p431_p9 = scmp.lt.s32.totalorder %s341_s14, %s341_s14 }
  0xbd   :  { %v217_v57 = vrot.slane %v212_v52, %v216_v41  ;;  %v221_v58 = vrot.slane %v212_v52, %v220_v45  ;;  %p427_p8 = scmp.ne.s32.totalorder %s341_s14, %s426_s15  ;;  %p432_p10 = scmp.lt.s32.totalorder %s426_s15, %s426_s15 }
  0xbe   :  { %v282_v55 = vrot.slane %v277_v53, %v216_v41  ;;  %v286_v56 = vrot.slane %v277_v53, %v220_v45 }
  0xbf   :  { %v222_v60 = vcombine.low %v217_v57, %v221_v58  ;;  %p433_p11 = por %p432_p10, %p431_p9 }
  0xc0   :  { %v287_v59 = vcombine.low %v282_v55, %v286_v56 }
  0xc1   :  { %v229_v62 = vrot.slane %v222_v60, %v228_v54  ;;  %p434_p12 = pnand %p433_p11, %p427_p8 }
  0xc2   :  { %v294_v61 = vrot.slane %v287_v59, %v228_v54  ;;  %v178_v2 = vld [vmem:[#allocation6] sm:$0x3] }
  0xc3   :  { %v236_v0 = vrot.slane %v229_v62, %v228_v54  ;;  %v194_v44 = vmax.f32 %v178_v2, %v193_v37 }
  0xc4   :  { %v301_v63 = vrot.slane %v294_v61, %v228_v54 }
  0xc5   :  { %238 = vperm.xlu0 %402, %v236_v0   ;;  %195 = vst.msk [vmem:[#allocation6] sm:$0x3] %vm56_vm0, %v194_v44 }
  0xc6   :  { %303 = vperm.xlu1 %403, %v301_v63  }
  0xc7   :  { %437 = shalt.err (!%p434_p12)
}
  0xc8   :  { %s438_s18 = scalar_lea.hbm %s684_s4, 32 }
  0xc9   :  { %p439_p13 = scmp.ne.s32.totalorder %s684_s4, %s438_s18  ;;  %p442_p0 = scmp.lt.u32.totalorder %s438_s18, %s684_s4 }
  0xcb   :  { %p444_p1 = pnand %p442_p0, %p439_p13 }
  0xcd   :  { %447 = shalt.err (!%p444_p1)
}
  0xce   :  { %343 = dma.vmem_to_hbm [thread:$0]  %s341_s14, 32, %s684_s4, [#allocation5]   ;;  %v262_v6 = vld [vmem:[#allocation9] sm:$0x1]  ;;  %v196_v7 = vld [vmem:[#allocation7] sm:$0x1] }
  0xcf   :  { %s506_s25 = smov [#allocation7]   ;;  %s507_s27 = smov [#allocation9]  }
  0xd0   :  { %s350_s26 = sshll.u32 %s506_s25, 4  ;;  %s360_s28 = sshll.u32 %s507_s27, 4  ;;  %s351_s26 = int_to_ptr.vmem [resolvable:$true] %s350_s26  ;;  %s646_s28 = int_to_ptr.vmem [resolvable:$true] %s360_s28 }
  0xd1   :  { %s448_s4 = scalar_lea.vmem %s351_s26, 16  ;;  %s452_s29 = scalar_lea.vmem %s351_s26, 32 }
  0xd2   :  { %p449_p2 = scmp.ne.s32.totalorder %s351_s26, %s448_s4  ;;  %p453_p3 = scmp.lt.s32.totalorder %s351_s26, %s351_s26 }
  0xd3   :  { %p454_p4 = scmp.lt.s32.totalorder %s452_s29, %s448_s4 }
  0xd5   :  { %p455_p5 = por %p454_p4, %p453_p3 }
  0xd7   :  { %p456_p6 = pnand %p455_p5, %p449_p2 }
 0x144   :  { %v239_v36 = vpop.permute.xlu0 %238 }
 0x145   :  { %v304_v30 = vpop.permute.xlu1 %303  ;;  %v243_v3 = vrot.slane %v239_v36, %v587_v48 }
 0x146   :  { %v308_v37 = vrot.slane %v304_v30, %v587_v48 }
 0x147   :  { %v250_v5 = vrot.slane %v243_v3, %v228_v54 }
 0x148   :  { %v315_v4 = vrot.slane %v308_v37, %v228_v54 }
 0x149   :  { %v257_v9 = vrot.slane %v250_v5, %v228_v54 }
 0x14a   :  { %v322_v8 = vrot.slane %v315_v4, %v228_v54 }
 0x14b   :  { %v259_v11 = vmax.f32 %v196_v7, %v257_v9 }
 0x14c   :  { %v324_v10 = vmin.f32 %v262_v6, %v322_v8 }
 0x14d   :  { %261 = vst.msk [vmem:[#allocation7] sm:$0x1] %vm58_vm1, %v259_v11 }
 0x14e   :  { %325 = vst.msk [vmem:[#allocation9] sm:$0x1] %vm58_vm1, %v324_v10 }
 0x14f   :  { %459 = shalt.err (!%p456_p6)
}
 0x150   :  { %s460_s8 = scalar_lea.hbm %s685_s5, 16 }
 0x151   :  { %p461_p7 = scmp.ne.s32.totalorder %s685_s5, %s460_s8  ;;  %p464_p8 = scmp.lt.u32.totalorder %s460_s8, %s685_s5 }
 0x153   :  { %p466_p9 = pnand %p464_p8, %p461_p7 }
 0x155   :  { %469 = shalt.err (!%p466_p9)
}
 0x156   :  { %353 = dma.vmem_to_hbm [thread:$0]  %s351_s26, 16, %s685_s5, [#allocation8]  }
 0x157   :  { %s470_s2 = scalar_lea.vmem %s646_s28, 16  ;;  %s474_s13 = scalar_lea.vmem %s646_s28, 32 }
 0x158   :  { %p471_p10 = scmp.ne.s32.totalorder %s646_s28, %s470_s2  ;;  %p475_p11 = scmp.lt.s32.totalorder %s646_s28, %s646_s28 }
 0x159   :  { %p476_p12 = scmp.lt.s32.totalorder %s474_s13, %s470_s2 }
 0x15b   :  { %p477_p13 = por %p476_p12, %p475_p11 }
 0x15d   :  { %p478_p0 = pnand %p477_p13, %p471_p10 }
 0x15f   :  { %481 = shalt.err (!%p478_p0)
}
 0x160   :  { %s482_s15 = scalar_lea.hbm %s686_s6, 16 }
 0x161   :  { %p483_p1 = scmp.ne.s32.totalorder %s686_s6, %s482_s15  ;;  %p486_p2 = scmp.lt.u32.totalorder %s482_s15, %s686_s6 }
 0x163   :  { %p488_p3 = pnand %p486_p2, %p483_p1 }
 0x165   :  { %491 = shalt.err (!%p488_p3)
}
 0x166   :  { %363 = dma.vmem_to_hbm [thread:$0]  %s646_s28, 16, %s686_s6, [#allocation8]  }
 0x167   :  { %494 = dma.done.wait [#allocation5], 32  }
 0x168   :  { %495 = vsyncadd [#allocation5], 4294967264 }
 0x169   :  { %496 = dma.done.wait [#allocation8], 32  }
 0x16a   :  { %497 = vsyncadd [#allocation8], 4294967264 }
 0x16b   :  { %380 = vsyncpa [#allocation4], 1 }
 0x16c   :  { %381 = vsyncpa [#allocation5], 1 }
 0x16d   :  { %382 = vsyncpa [#allocation8], 1 }

</bundles_post_ra>
